<compile_context>
chip_gen: v7x
topology: tpu7x:2x2x1
jax: 0.10.0
libtpu: 0.0.40
codegen_flags: <defaults>
</compile_context>

<pallas_src>
import jax
import jax.numpy as jnp
from jax.experimental import pallas as pl
from jax.experimental.pallas import tpu as pltpu


def expand_temporal_dim_view(x_seq: jax.Array, T: int) -> jax.Array:
    """Zero-cost equivalent of ExpandTemporalDim(T): a pure reshape/view.

    This is the recommended path — it matches torch.Tensor.view semantics
    exactly and moves no data.
    """
    TB = x_seq.shape[0]
    assert TB % T == 0, "leading dim must be divisible by T"
    B = TB // T
    return jnp.reshape(x_seq, (T, B) + tuple(x_seq.shape[1:]))


def expand_temporal_dim(
    x_seq: jax.Array,
    T: int,
    *,
    max_chunks: int = 8,
    min_chunk_bytes: int = 1 << 20,  # ~1 MiB per DMA chunk minimum
) -> jax.Array:
    """Pallas equivalent of ExpandTemporalDim(T)(x_seq) as a materialized copy.

    Implemented as direct HBM->HBM DMA (no VMEM staging).  The surrounding
    reshapes are free, metadata-only views of contiguous buffers.
    """
    TB = x_seq.shape[0]
    assert TB % T == 0, "leading dim must be divisible by T"
    B = TB // T
    trailing = tuple(int(d) for d in x_seq.shape[1:])

    # Flatten trailing dims: (T*B, C, H, W) -> (T*B, L).  Free view; the copy
    # below is over contiguous row ranges of this 2-D view, so chunk shape is
    # irrelevant to correctness and has no (8,128) tiling constraint.
    L = 1
    for d in trailing:
        L *= d
    x2d = jnp.reshape(x_seq, (TB, L))

    itemsize = jnp.dtype(x_seq.dtype).itemsize
    total_bytes = TB * L * itemsize

    # A handful of independent DMA streams keeps the HBM pipes busy on v6e/v7x
    # without creating tiny transfers on small inputs.
    n_chunks = int(max(1, min(max_chunks, TB, total_bytes // min_chunk_bytes)))

    # Static, balanced row ranges (closed over by the kernel body).
    base, rem = divmod(TB, n_chunks)
    bounds = []
    row = 0
    for k in range(n_chunks):
        size = base + (1 if k < rem else 0)
        bounds.append((row, row + size))
        row += size

    def _hbm_copy_kernel(x_hbm, o_hbm, sems):
        # Issue all chunk DMAs (multiple outstanding streams), then wait.
        copies = []
        for k, (r0, r1) in enumerate(bounds):
            cp = pltpu.make_async_copy(
                x_hbm.at[r0:r1], o_hbm.at[r0:r1], sems.at[k]
            )
            cp.start()
            copies.append(cp)
        for cp in copies:
            cp.wait()

    y2d = pl.pallas_call(
        _hbm_copy_kernel,
        out_shape=jax.ShapeDtypeStruct((TB, L), x_seq.dtype),
        in_specs=[pl.BlockSpec(memory_space=pl.ANY)],
        out_specs=pl.BlockSpec(memory_space=pl.ANY),
        scratch_shapes=[pltpu.SemaphoreType.DMA((n_chunks,))],
    )(x2d)

    # Free view back to the target rank: (T*B, L) -> (T, B, C, H, W).
    return jnp.reshape(y2d, (T, B) + trailing)


if __name__ == "__main__":
    T = 4
    B = 2
    C = 4
    H = 16
    W = 16

    key = jax.random.PRNGKey(0)
    # Input as produced upstream of ExpandTemporalDim: time folded into batch.
    x_seq = jax.random.normal(key, (T * B, C, H, W), dtype=jnp.float32)

    # Pallas (materialized copy) path.
    y = expand_temporal_dim(x_seq, T)
    jax.block_until_ready(y)

    # Reference: pure reshape (view) semantics, identical to torch .view().
    y_ref = jnp.reshape(x_seq, (T, B, C, H, W))

    assert y.shape == (T, B, C, H, W), y.shape
    assert y.dtype == x_seq.dtype
    assert jnp.array_equal(y, y_ref), "mismatch vs. reshape reference"

    # Recommended zero-cost production path.
    y_view = expand_temporal_dim_view(x_seq, T)
    assert jnp.array_equal(y_view, y_ref)

    print("KERNEL_OK")
</pallas_src>

<mosaic_0001>
module attributes {stable_mosaic.version = 11 : i64} {
  func.func @_hbm_copy_kernel(%arg0: memref<8x1024xf32, #tpu.memory_space<any>>, %arg1: memref<8x1024xf32, #tpu.memory_space<any>>, %arg2: memref<1x!tpu.dma_semaphore, #tpu.memory_space<semaphore_mem>>) attributes {dimension_semantics = [], scalar_prefetch = 0 : i64, scratch_operands = 1 : i64, tpu.core_type = #tpu.core_type<tc>} {
    %c0_i32 = arith.constant 0 : i32
    %c0_i32_0 = arith.constant 0 : i32
    %c0_i32_1 = arith.constant 0 : i32
    %0 = tpu.memref_slice %arg0[%c0_i32_0, %c0_i32_1] : memref<8x1024xf32, #tpu.memory_space<any>> -> memref<8x1024xf32, #tpu.memory_space<any>>
    %c0_i32_2 = arith.constant 0 : i32
    %c0_i32_3 = arith.constant 0 : i32
    %1 = tpu.memref_slice %arg1[%c0_i32_2, %c0_i32_3] : memref<8x1024xf32, #tpu.memory_space<any>> -> memref<8x1024xf32, #tpu.memory_space<any>>
    %2 = tpu.memref_slice %arg2[%c0_i32] : memref<1x!tpu.dma_semaphore, #tpu.memory_space<semaphore_mem>> -> memref<1x!tpu.dma_semaphore, #tpu.memory_space<semaphore_mem>>
    %3 = tpu.memref_squeeze %2 : memref<1x!tpu.dma_semaphore, #tpu.memory_space<semaphore_mem>> -> memref<!tpu.dma_semaphore, #tpu.memory_space<semaphore_mem>>
    tpu.enqueue_dma source(%0 : memref<8x1024xf32, #tpu.memory_space<any>>) target(%1 : memref<8x1024xf32, #tpu.memory_space<any>>) target_semaphore(%3 : memref<!tpu.dma_semaphore, #tpu.memory_space<semaphore_mem>>)
    %c0_i32_4 = arith.constant 0 : i32
    %c0_i32_5 = arith.constant 0 : i32
    %c0_i32_6 = arith.constant 0 : i32
    %4 = tpu.memref_slice %arg0[%c0_i32_5, %c0_i32_6] : memref<8x1024xf32, #tpu.memory_space<any>> -> memref<8x1024xf32, #tpu.memory_space<any>>
    %c0_i32_7 = arith.constant 0 : i32
    %c0_i32_8 = arith.constant 0 : i32
    %5 = tpu.memref_slice %arg1[%c0_i32_7, %c0_i32_8] : memref<8x1024xf32, #tpu.memory_space<any>> -> memref<8x1024xf32, #tpu.memory_space<any>>
    %6 = tpu.memref_slice %arg2[%c0_i32_4] : memref<1x!tpu.dma_semaphore, #tpu.memory_space<semaphore_mem>> -> memref<1x!tpu.dma_semaphore, #tpu.memory_space<semaphore_mem>>
    %7 = tpu.memref_squeeze %6 : memref<1x!tpu.dma_semaphore, #tpu.memory_space<semaphore_mem>> -> memref<!tpu.dma_semaphore, #tpu.memory_space<semaphore_mem>>
    tpu.wait_dma2 semaphore(%7 : memref<!tpu.dma_semaphore, #tpu.memory_space<semaphore_mem>>) src(%4 : memref<8x1024xf32, #tpu.memory_space<any>>) dst(%5 : memref<8x1024xf32, #tpu.memory_space<any>>)
    return
  }
}

</mosaic_0001>

<bundles_post_ra>
// kernel: tpu_custom_call.1
= control target key start
LH: loop header
LB: loop body
LE: loop exit
PB: predicated region body
PF: predicated region fallthrough
CT: control target
= control target key end

     0   :  { %s35_s6 = smov [#allocation2]   ;;  %s36_s7 = smov [#allocation3]   ;;  %s54_s0 = inlined_call_operand.hbm [shape: f32[8,1024], index: 0, kind: input, shape index: {}]   ;;  %s55_s1 = inlined_call_operand.hbm [shape: f32[8,1024], index: 1, kind: output, shape index: {}]  }
   0x1   :  { %s37_s8 = smov 0  }
   0x2   :  { %18 = dma.general %s54_s0, 1024, %s55_s1, %s35_s6, %s36_s7, [#allocation4], %s37_s8, 0  }
   0x3   :  { %33 = dma.done.wait [#allocation2], 1024 }
   0x4   :  { %34 = vsyncadd [#allocation2], 4294966272 }
   0x5   :  { %23 = vsyncmov [#allocation2] }
   0x8   :  { %s24_s13 = vpop.sfrf %23 }
   0x9   :  { %p29_p0 = scmp.ne.s32.totalorder %s24_s13, 0 }
   0xb   :  { %28 = shalt.err (%p29_p0)  }

</bundles_post_ra>
